<compile_context>
chip_gen: v5e
topology: v5e:2x2
jax: 0.10.0
libtpu: 0.0.40
codegen_flags: <defaults>
</compile_context>

<pallas_src>
import functools

import jax
import jax.numpy as jnp
from jax.experimental import pallas as pl
from jax.experimental.pallas import tpu as pltpu


def _round_up(x, m):
    return (x + m - 1) // m * m


def _pick_tile(total, cap, quantum):
    """Largest multiple of `quantum` that divides `total` and is <= cap.

    `total` must already be a multiple of `quantum`, so this always succeeds
    (worst case returns `quantum`)."""
    cap = min(cap, total)
    t = (cap // quantum) * quantum
    while t > quantum and total % t != 0:
        t -= quantum
    return max(t, quantum)


# Fused-gather edge decode keeps Z^T resident in VMEM and builds (N, TE)
# one-hot selectors; cap N so those temporaries stay a couple of MiB.
_FUSED_GATHER_MAX_NODES = 1024


# ----------------------------- Pallas kernels ------------------------------

def _encoder_kernel(x_ref, w1_ref, b1_ref, w2_ref, b2_ref, z_ref):
    # One row-tile of Z = relu(X @ W1 + b1) @ W2 + b2, weights resident.
    # TODO(synk): cast MXU operands to bf16 (f32 accumulate) for ~2-4x MXU
    # throughput once the reference tolerance allows it.
    h = jnp.dot(x_ref[...], w1_ref[...], preferred_element_type=jnp.float32)
    h = jnp.maximum(h + b1_ref[...], 0.0)
    z = jnp.dot(h, w2_ref[...], preferred_element_type=jnp.float32) + b2_ref[...]
    # NOTE: out block is (tm, D); for D < 128 this is a masked store, but the
    # module contract is a (N, D) latent so we keep the layout.
    z_ref[...] = z.astype(z_ref.dtype)


def _edge_decode_fused_kernel(idx_ref, zt_ref, out_ref, *, apply_sigmoid, n_nodes):
    # idx_ref: (2, TE) int32 edge-index tile; zt_ref: (D, N) resident Z^T.
    # Gather endpoints in-kernel via one-hot selectors on the MXU (exact),
    # reduce over D along sublanes -> lane-dense (1, TE) output.
    src = idx_ref[0:1, :]                                    # (1, TE)
    dst = idx_ref[1:2, :]                                    # (1, TE)
    te = src.shape[1]
    node_ids = jax.lax.broadcasted_iota(jnp.int32, (n_nodes, te), 0)
    oh_s = (node_ids == src).astype(jnp.float32)             # (N, TE)
    oh_d = (node_ids == dst).astype(jnp.float32)             # (N, TE)
    zs = jnp.dot(zt_ref[...], oh_s, preferred_element_type=jnp.float32)  # (D, TE)
    zd = jnp.dot(zt_ref[...], oh_d, preferred_element_type=jnp.float32)  # (D, TE)
    v = jnp.sum(zs * zd, axis=0, keepdims=True)              # (1, TE)
    if apply_sigmoid:
        v = jax.nn.sigmoid(v)
    out_ref[...] = v.astype(out_ref.dtype)


def _edge_decode_lane_kernel(zs_ref, zd_ref, out_ref, *, apply_sigmoid):
    # Fallback (large N): pre-gathered endpoints laid out (D, TE); sublane
    # reduce over D; lane-dense (1, TE) output.
    v = jnp.sum(zs_ref[...] * zd_ref[...], axis=0, keepdims=True)
    if apply_sigmoid:
        v = jax.nn.sigmoid(v)
    out_ref[...] = v.astype(out_ref.dtype)


def _dense_decode_kernel(zi_ref, zj_ref, adj_ref, *, apply_sigmoid):
    # adj_tile = [sigmoid](Z_i @ Z_j^T) via dot_general contracting the last
    # dim of both operands (MXU trans_b path, no materialized transpose).
    adj = jax.lax.dot_general(
        zi_ref[...], zj_ref[...],
        dimension_numbers=(((1,), (1,)), ((), ())),
        preferred_element_type=jnp.float32)
    if apply_sigmoid:
        # TODO(synk): on v7x an approx-EUP sigmoid (pl.reciprocal(approx=True))
        # shaves EUP/VPU cycles, at the cost of exactness vs. the reference.
        adj = jax.nn.sigmoid(adj)
    adj_ref[...] = adj.astype(adj_ref.dtype)


# ------------------------------ JAX wrappers --------------------------------

@jax.jit
def gae_encode(x, w1, b1, w2, b2):
    n, f_in = x.shape
    hid = w1.shape[1]
    d = w2.shape[1]

    # Pad rows only to the 8-sublane quantum, then pick a row tile that
    # divides the padded extent (no over-padding to the tile size).
    n_pad = _round_up(n, 8)
    if n_pad != n:
        x = jnp.pad(x, ((0, n_pad - n), (0, 0)))
    tm = _pick_tile(n_pad, 512, 8)

    z = pl.pallas_call(
        _encoder_kernel,
        out_shape=jax.ShapeDtypeStruct((n_pad, d), jnp.float32),
        grid_spec=pltpu.PrefetchScalarGridSpec(
            num_scalar_prefetch=0,
            grid=(n_pad // tm,),
            in_specs=[
                pl.BlockSpec((tm, f_in), lambda i: (i, 0)),   # X row tile
                pl.BlockSpec((f_in, hid), lambda i: (0, 0)),  # W1 (resident)
                pl.BlockSpec((1, hid), lambda i: (0, 0)),     # b1
                pl.BlockSpec((hid, d), lambda i: (0, 0)),     # W2
                pl.BlockSpec((1, d), lambda i: (0, 0)),       # b2
            ],
            out_specs=pl.BlockSpec((tm, d), lambda i: (i, 0)),
        ),
        compiler_params=pltpu.CompilerParams(
            dimension_semantics=("parallel",)),
    )(x, w1, b1, w2, b2)
    return z[:n]


@functools.partial(jax.jit, static_argnames=("sigmoid",))
def gae_decode(z, edge_index, sigmoid=True):
    n, d = z.shape
    e = edge_index.shape[1]

    edge_index = edge_index.astype(jnp.int32)
    e_pad = _round_up(e, 128)
    if e_pad != e:
        edge_index = jnp.pad(edge_index, ((0, 0), (0, e_pad - e)))

    if n <= _FUSED_GATHER_MAX_NODES:
        # Fused gather: Z^T resident in VMEM, edge-index tile in VMEM, one-hot
        # MXU gather inside the kernel. No (E, D) materialization in HBM.
        te = _pick_tile(e_pad, 512, 128)
        zt = z.T  # one-time (N, D) transpose, O(N*D) -- not per-edge work
        kernel = functools.partial(
            _edge_decode_fused_kernel, apply_sigmoid=sigmoid, n_nodes=n)
        out = pl.pallas_call(
            kernel,
            out_shape=jax.ShapeDtypeStruct((1, e_pad), jnp.float32),
            grid_spec=pltpu.PrefetchScalarGridSpec(
                num_scalar_prefetch=0,
                grid=(e_pad // te,),
                in_specs=[
                    pl.BlockSpec((2, te), lambda i: (0, i)),  # edge-index tile
                    pl.BlockSpec((d, n), lambda i: (0, 0)),   # Z^T (resident)
                ],
                out_specs=pl.BlockSpec((1, te), lambda i: (0, i)),
            ),
            compiler_params=pltpu.CompilerParams(
                dimension_semantics=("parallel",)),
        )(edge_index, zt)
    else:
        # TODO(synk): for huge graphs the gather still happens in XLA; fuse it
        # via in-kernel jnp.take / DMA row gather once Mosaic gather covers it.
        te = _pick_tile(e_pad, 2048, 128)
        zs = jnp.take(z, edge_index[0], axis=0).T   # (D, E_pad)
        zd = jnp.take(z, edge_index[1], axis=0).T   # (D, E_pad)
        kernel = functools.partial(_edge_decode_lane_kernel, apply_sigmoid=sigmoid)
        out = pl.pallas_call(
            kernel,
            out_shape=jax.ShapeDtypeStruct((1, e_pad), jnp.float32),
            grid_spec=pltpu.PrefetchScalarGridSpec(
                num_scalar_prefetch=0,
                grid=(e_pad // te,),
                in_specs=[
                    pl.BlockSpec((d, te), lambda i: (0, i)),
                    pl.BlockSpec((d, te), lambda i: (0, i)),
                ],
                out_specs=pl.BlockSpec((1, te), lambda i: (0, i)),
            ),
            compiler_params=pltpu.CompilerParams(
                dimension_semantics=("parallel",)),
        )(zs, zd)
    return out[0, :e]


@functools.partial(jax.jit, static_argnames=("sigmoid",))
def gae_decode_all(z, sigmoid=True):
    n, d = z.shape

    # Pad N only to the 128-lane quantum (bounds writeback waste), then pick
    # row/col tiles that divide the padded extent. Tiles capped at 512 so the
    # double-buffered (tr, tc) f32 out tile stays ~2 MiB (safe under v7x's
    # scoped-VMEM default; v5e/v6e have more headroom).
    # TODO(synk): bf16 adjacency output would halve the dominant N^2 writeback.
    n_pad = _round_up(n, 128)
    if n_pad != n:
        z = jnp.pad(z, ((0, n_pad - n), (0, 0)))
    tr = _pick_tile(n_pad, 512, 8)
    tc = _pick_tile(n_pad, 512, 128)

    kernel = functools.partial(_dense_decode_kernel, apply_sigmoid=sigmoid)
    adj = pl.pallas_call(
        kernel,
        out_shape=jax.ShapeDtypeStruct((n_pad, n_pad), jnp.float32),
        grid_spec=pltpu.PrefetchScalarGridSpec(
            num_scalar_prefetch=0,
            grid=(n_pad // tr, n_pad // tc),
            in_specs=[
                pl.BlockSpec((tr, d), lambda i, j: (i, 0)),   # Z row tile
                pl.BlockSpec((tc, d), lambda i, j: (j, 0)),   # Z col tile
            ],
            out_specs=pl.BlockSpec((tr, tc), lambda i, j: (i, j)),
        ),
        compiler_params=pltpu.CompilerParams(
            dimension_semantics=("parallel", "parallel")),
    )(z, z)
    return adj[:n, :n]


class GAEPallas:
    """GAE with an MLP encoder + InnerProductDecoder, heavy math in Pallas."""

    def __init__(self, key, in_feats, hidden, latent):
        k1, k2, k3, k4 = jax.random.split(key, 4)
        s1 = 1.0 / jnp.sqrt(in_feats)
        s2 = 1.0 / jnp.sqrt(hidden)
        self.w1 = jax.random.uniform(k1, (in_feats, hidden), jnp.float32, -s1, s1)
        self.b1 = jax.random.uniform(k2, (1, hidden), jnp.float32, -s1, s1)
        self.w2 = jax.random.uniform(k3, (hidden, latent), jnp.float32, -s2, s2)
        self.b2 = jax.random.uniform(k4, (1, latent), jnp.float32, -s2, s2)

    # GAE.forward is an alias of encode (runs the encoder)
    def __call__(self, x):
        return self.encode(x)

    def encode(self, x):
        return gae_encode(x, self.w1, self.b1, self.w2, self.b2)

    def decode(self, z, edge_index, sigmoid=True):
        return gae_decode(z, edge_index, sigmoid=sigmoid)

    def decode_all(self, z, sigmoid=True):
        return gae_decode_all(z, sigmoid=sigmoid)


# ---------------------------------- main ------------------------------------

if __name__ == "__main__":
    N, F_IN, HID, LAT, E = 16, 32, 32, 16, 8

    key = jax.random.PRNGKey(0)
    k_x, k_e, k_w = jax.random.split(key, 3)

    x = jax.random.normal(k_x, (N, F_IN), dtype=jnp.float32)
    edge_index = jax.random.randint(k_e, (2, E), 0, N, dtype=jnp.int32)

    model = GAEPallas(k_w, F_IN, HID, LAT)

    # forward == encode
    z = model(x)
    edge_probs = model.decode(z, edge_index, sigmoid=True)
    edge_logits = model.decode(z, edge_index, sigmoid=False)
    adj = model.decode_all(z, sigmoid=True)
    adj_raw = model.decode_all(z, sigmoid=False)

    jax.block_until_ready((z, edge_probs, edge_logits, adj, adj_raw))

    # Reference check in plain JAX (same math, no Pallas).
    h_ref = jnp.maximum(x @ model.w1 + model.b1, 0.0)
    z_ref = h_ref @ model.w2 + model.b2
    el_ref = jnp.sum(z_ref[edge_index[0]] * z_ref[edge_index[1]], axis=-1)
    ep_ref = jax.nn.sigmoid(el_ref)
    adj_raw_ref = z_ref @ z_ref.T
    adj_ref = jax.nn.sigmoid(adj_raw_ref)

    assert jnp.allclose(z, z_ref, atol=1e-5, rtol=1e-5)
    assert jnp.allclose(edge_probs, ep_ref, atol=1e-5, rtol=1e-5)
    assert jnp.allclose(edge_logits, el_ref, atol=1e-4, rtol=1e-5)
    assert jnp.allclose(adj, adj_ref, atol=1e-5, rtol=1e-5)
    assert jnp.allclose(adj_raw, adj_raw_ref, atol=1e-4, rtol=1e-5)

    print("KERNEL_OK")
</pallas_src>

<mosaic_0001>
module attributes {stable_mosaic.version = 11 : i64} {
  func.func @_encoder_kernel(%arg0: i32, %arg1: memref<16x32xf32, #tpu.memory_space<vmem>>, %arg2: memref<32x32xf32, #tpu.memory_space<vmem>>, %arg3: memref<1x32xf32, #tpu.memory_space<vmem>>, %arg4: memref<32x16xf32, #tpu.memory_space<vmem>>, %arg5: memref<1x16xf32, #tpu.memory_space<vmem>>, %arg6: memref<16x16xf32, #tpu.memory_space<vmem>>) attributes {dimension_semantics = [#tpu.dimension_semantics<parallel>], iteration_bounds = array<i64: 1>, scalar_prefetch = 0 : i64, scratch_operands = 0 : i64, tpu.core_type = #tpu.core_type<tc>, window_params = [{transform_indices = @transform_0, window_bounds = array<i64: 16, 32>}, {pipeline_mode = #tpu.pipeline_mode<synchronous>, transform_indices = @transform_1, window_bounds = array<i64: 32, 32>}, {pipeline_mode = #tpu.pipeline_mode<synchronous>, transform_indices = @transform_2, window_bounds = array<i64: 1, 32>}, {pipeline_mode = #tpu.pipeline_mode<synchronous>, transform_indices = @transform_3, window_bounds = array<i64: 32, 16>}, {pipeline_mode = #tpu.pipeline_mode<synchronous>, transform_indices = @transform_4, window_bounds = array<i64: 1, 16>}, {transform_indices = @transform_5, window_bounds = array<i64: 16, 16>}]} {
    %c0 = arith.constant 0 : index
    %c0_0 = arith.constant 0 : index
    %0 = vector.load %arg1[%c0, %c0_0] : memref<16x32xf32, #tpu.memory_space<vmem>>, vector<16x32xf32>
    %c0_1 = arith.constant 0 : index
    %c0_2 = arith.constant 0 : index
    %1 = vector.load %arg2[%c0_1, %c0_2] : memref<32x32xf32, #tpu.memory_space<vmem>>, vector<32x32xf32>
    %cst = arith.constant dense<0.000000e+00> : vector<16x32xf32>
    %2 = tpu.matmul %0, %1, %cst {dimension_numbers = #tpu.dot_dimension_numbers<[1], [0], [0], [1], [0, 0, 1, 1], [], []>} : vector<16x32xf32>, vector<32x32xf32>, vector<16x32xf32> -> vector<16x32xf32>
    %c0_3 = arith.constant 0 : index
    %c0_4 = arith.constant 0 : index
    %3 = vector.load %arg3[%c0_3, %c0_4] : memref<1x32xf32, #tpu.memory_space<vmem>>, vector<1x32xf32>
    %4 = vector.broadcast %3 : vector<1x32xf32> to vector<16x32xf32>
    %5 = arith.addf %2, %4 : vector<16x32xf32>
    %cst_5 = arith.constant 0.000000e+00 : f32
    %6 = vector.broadcast %cst_5 : f32 to vector<16x32xf32>
    %7 = arith.maximumf %5, %6 : vector<16x32xf32>
    %c0_6 = arith.constant 0 : index
    %c0_7 = arith.constant 0 : index
    %8 = vector.load %arg4[%c0_6, %c0_7] : memref<32x16xf32, #tpu.memory_space<vmem>>, vector<32x16xf32>
    %cst_8 = arith.constant dense<0.000000e+00> : vector<16x16xf32>
    %9 = tpu.matmul %7, %8, %cst_8 {dimension_numbers = #tpu.dot_dimension_numbers<[1], [0], [0], [1], [0, 0, 1, 1], [], []>} : vector<16x32xf32>, vector<32x16xf32>, vector<16x16xf32> -> vector<16x16xf32>
    %c0_9 = arith.constant 0 : index
    %c0_10 = arith.constant 0 : index
    %10 = vector.load %arg5[%c0_9, %c0_10] : memref<1x16xf32, #tpu.memory_space<vmem>>, vector<1x16xf32>
    %11 = vector.broadcast %10 : vector<1x16xf32> to vector<16x16xf32>
    %12 = arith.addf %9, %11 : vector<16x16xf32>
    %c0_11 = arith.constant 0 : index
    %c0_12 = arith.constant 0 : index
    %13 = vector.load %arg6[%c0_11, %c0_12] : memref<16x16xf32, #tpu.memory_space<vmem>>, vector<16x16xf32>
    tpu.vector_store %arg6[%c0_11, %c0_12], %12 {strides = array<i32>} : memref<16x16xf32, #tpu.memory_space<vmem>>, vector<16x16xf32>,
    return
  }
  func.func @transform_0(%arg0: i32) -> (i32, i32) {
    %c0_i32 = arith.constant 0 : i32
    %c0_i32_0 = arith.constant 0 : i32
    return %arg0, %c0_i32 : i32, i32
  }
  func.func @transform_1(%arg0: i32) -> (i32, i32) {
    %c0_i32 = arith.constant 0 : i32
    %c0_i32_0 = arith.constant 0 : i32
    %c0_i32_1 = arith.constant 0 : i32
    return %c0_i32, %c0_i32_0 : i32, i32
  }
  func.func @transform_2(%arg0: i32) -> (i32, i32) {
    %c0_i32 = arith.constant 0 : i32
    %c0_i32_0 = arith.constant 0 : i32
    %c0_i32_1 = arith.constant 0 : i32
    return %c0_i32, %c0_i32_0 : i32, i32
  }
  func.func @transform_3(%arg0: i32) -> (i32, i32) {
    %c0_i32 = arith.constant 0 : i32
    %c0_i32_0 = arith.constant 0 : i32
    %c0_i32_1 = arith.constant 0 : i32
    return %c0_i32, %c0_i32_0 : i32, i32
  }
  func.func @transform_4(%arg0: i32) -> (i32, i32) {
    %c0_i32 = arith.constant 0 : i32
    %c0_i32_0 = arith.constant 0 : i32
    %c0_i32_1 = arith.constant 0 : i32
    return %c0_i32, %c0_i32_0 : i32, i32
  }
  func.func @transform_5(%arg0: i32) -> (i32, i32) {
    %c0_i32 = arith.constant 0 : i32
    %c0_i32_0 = arith.constant 0 : i32
    return %arg0, %c0_i32 : i32, i32
  }
}

</mosaic_0001>

<bundles_post_ra>
// kernel: gae_encode.1
= control target key start
LH: loop header
LB: loop body
LE: loop exit
PB: predicated region body
PF: predicated region fallthrough
CT: control target
= control target key end

     0   :  { %s240_s0 = inlined_call_operand.vmem [shape: f32[16,32], index: 0, kind: input, shape index: {}]   ;;  %s241_s1 = inlined_call_operand.vmem [shape: f32[32,32], index: 1, kind: input, shape index: {}]   ;;  %s242_s2 = inlined_call_operand.vmem [shape: f32[1,32], index: 2, kind: input, shape index: {}]   ;;  %s243_s3 = inlined_call_operand.vmem [shape: f32[32,16], index: 3, kind: input, shape index: {}]   ;;  %s244_s4 = inlined_call_operand.vmem [shape: f32[1,16], index: 4, kind: input, shape index: {}]   ;;  %s245_s5 = inlined_call_operand.hbm [shape: f32[16,16], index: 5, kind: output, shape index: {}]  }
   0x1   :  { %v26_v0 = vld [vmem:[%s241_s1 + $0x18] sm:$0xff]  ;;  %v25_v1 = vld [vmem:[%s241_s1 + $0x10] sm:$0xff]  ;;  %v24_v2 = vld [vmem:[%s241_s1 + $0x8] sm:$0xff] }
   0x2   :  { %125 = vmatpush.msra.mxu2 %v26_v0  ;;  %50 = vmatpush.msra.mxu0 %v26_v0  ;;  %v66_v3 = vld [vmem:[%s243_s3 + $0x18] sm:$0xff] }
   0x4   :  { %126 = vmatpush.msra.mxu2 %v25_v1  ;;  %51 = vmatpush.msra.mxu0 %v25_v1 }
   0x5   :  { %10 = vsyncpa [#allocation3], 0  ;;  %v23_v4 = vld [vmem:[%s241_s1] sm:$0xff]  ;;  %129 = vmatpush.msra.mxu3 %v66_v3  ;;  %89 = vmatpush.msra.mxu1 %v66_v3  ;;  %v22_v5 = vld [vmem:[%s240_s0 + $0x8] sm:$0xff]  ;;  %vm31_vm0 = vcmask 261120   ;;  %vm100_vm1 = vcmask 130048  }
   0x6   :  { %127 = vmatpush.msra.mxu2 %v24_v2  ;;  %52 = vmatpush.msra.mxu0 %v24_v2  ;;  %v21_v6 = vld [vmem:[%s240_s0] sm:$0xff]  ;;  %v65_v7 = vld [vmem:[%s243_s3 + $0x10] sm:$0xff]  ;;  %v64_v8 = vld [vmem:[%s243_s3 + $0x8] sm:$0xff]  ;;  %s109_s17 = sshll.u32 %s245_s5, 4  ;;  %s165_s18 = smov 128   ;;  %s110_s17 = int_to_ptr.hbm [resolvable:$true] %s109_s17 }
   0x7   :  { %130 = vmatpush.msra.mxu3 %v65_v7  ;;  %90 = vmatpush.msra.mxu1 %v65_v7  ;;  %v63_v9 = vld [vmem:[%s243_s3] sm:$0xff]  ;;  %s164_s3 = smov [#allocation2]   ;;  %s166_s19 = smov 8  }
   0x8   :  { %128 = vmatpush.msra.mxu2 %v23_v4  ;;  %53 = vmatpush.msra.mxu0 %v23_v4  ;;  %v136_v10 = vld [vmem:[%s242_s2] ss:$0 sm:$0xff]  ;;  %s107_s2 = sshll.u32 %s164_s3, 4  ;;  %s108_s2 = int_to_ptr.vmem [resolvable:$true] %s107_s2 }
   0x9   :  { %122 = vmatmul.msk.f32.vlgmr.msra.gmra.mxu2 %vm31_vm0, %v22_v5  ;;  %121 = vmatmul.msk.f32.vlgmr.msra.gmra.mxu0 %vm31_vm0, %v21_v6  ;;  %v137_v17 = vld [vmem:[%s244_s4] ss:$0 sm:$0xff] }
   0xa   :  { %131 = vmatpush.msra.mxu3 %v64_v8  ;;  %91 = vmatpush.msra.mxu1 %v64_v8 }
   0xc   :  { %132 = vmatpush.msra.mxu3 %v63_v9  ;;  %92 = vmatpush.msra.mxu1 %v63_v9 }
  0x86   :  { %v55_v11 = vpop.f32.mrf.mxu0 }
  0x87   :  { %v56_v12 = vadd.f32 %v136_v10, %v55_v11 }
  0x89   :  { %v61_v13 = vmax.f32 %v56_v12, 0.0 }
  0x8b   :  { %123 = vmatmul.msk.f32.vlgmr.msra.gmra.mxu1 %vm31_vm0, %v61_v13 }
  0x8c   :  { %v58_v14 = vpop.f32.mrf.mxu2 }
  0x8d   :  { %v59_v15 = vadd.f32 %v136_v10, %v58_v14 }
  0x8f   :  { %v62_v16 = vmax.f32 %v59_v15, 0.0 }
  0x91   :  { %124 = vmatmul.msk.f32.vlgmr.msra.gmra.mxu3 %vm31_vm0, %v62_v16 }
 0x108   :  { %v94_v18 = vpop.f32.mrf.mxu1 }
 0x109   :  { %v95_v19 = vadd.f32 %v137_v17, %v94_v18 }
 0x10b   :  { %101 = vst.msk [vmem:[#allocation2] sm:$0xff] %vm100_vm1, %v95_v19 }
 0x114   :  { %v97_v20 = vpop.f32.mrf.mxu3 }
 0x115   :  { %v98_v21 = vadd.f32 %v137_v17, %v97_v20 }
 0x117   :  { %102 = vst.msk [vmem:[#allocation2 + $0x8] sm:$0xff] %vm100_vm1, %v98_v21 }
 0x118   :  { %115 = dma.vmem_to_hbm [thread:$0]  %s108_s2, 256, %s110_s17, [#allocation3], %s165_s18, %s165_s18, %s166_s19  }
 0x119   :  { %162 = dma.done.wait [#allocation3], 256  }
 0x11a   :  { %163 = vsyncadd [#allocation3], 4294967040 }
 0x11b   :  { %120 = vsyncpa [#allocation3], 1 }

</bundles_post_ra>
